<compile_context>
chip_gen: v6e
topology: v6e:2x2x1
jax: 0.10.0
libtpu: 0.0.40
codegen_flags: <defaults>
</compile_context>

<pallas_src>
import functools
import math

import jax
import jax.numpy as jnp
from jax import lax
from jax.experimental import pallas as pl
from jax.experimental.pallas import tpu as pltpu

LEAKY_SLOPE = 0.01     # PyTorch nn.LeakyReLU default negative_slope
HEAD_WIDTH = 128       # lane-dense width of the fused actor+critic head output
MIN_TILE_B = 16        # bf16 packs 16 sublanes per vreg
MAX_TILE_B = 1024      # big tiles amortize per-grid-step overhead; still only ~a few MB VMEM


def _leaky_relu(x):
    return jnp.where(x > 0, x, LEAKY_SLOPE * x)


def _round_up(v, m):
    return ((v + m - 1) // m) * m


def actor_critic_kernel(
    x_ref,                # [TILE_B, FEAT_PAD]  bf16 (lane-dense, zero padded)
    w1_ref, b1_ref,       # bf16 [FEAT_PAD, 256], f32 [1, 256]
    w2_ref, b2_ref,       # bf16 [256, 256],      f32 [1, 256]
    w3_ref, b3_ref,       # bf16 [256, 128],      f32 [1, 128]
    wh_ref, bh_ref,       # fused (actor | critic | zero-pad) head, bf16 [128,128], f32 [1,128]
    out_ref,              # [TILE_B, HEAD_WIDTH] f32 lane-dense output slab
    *,
    n_actions,
):
    x = x_ref[...]  # bf16

    # shared trunk: Linear -> LeakyReLU (x3); bf16 MXU operands, f32 accumulate,
    # elementwise LeakyReLU on the f32 accumulator, cast back to bf16 for next dot.
    h = jnp.dot(x, w1_ref[...], preferred_element_type=jnp.float32) + b1_ref[...]
    h = _leaky_relu(h).astype(jnp.bfloat16)
    h = jnp.dot(h, w2_ref[...], preferred_element_type=jnp.float32) + b2_ref[...]
    h = _leaky_relu(h).astype(jnp.bfloat16)
    h = jnp.dot(h, w3_ref[...], preferred_element_type=jnp.float32) + b3_ref[...]
    h = _leaky_relu(h).astype(jnp.bfloat16)

    # fused actor+critic head: single MXU push, lane-dense result (f32)
    head = jnp.dot(h, wh_ref[...], preferred_element_type=jnp.float32) + bh_ref[...]

    # softmax over the first n_actions lanes only (padded lanes masked to -inf).
    # Exact divide (not approx reciprocal) so probs sum to 1 to f32 precision.
    col = lax.broadcasted_iota(jnp.int32, head.shape, 1)
    logits = jnp.where(col < n_actions, head, jnp.float32(-jnp.inf))
    m = jnp.max(logits, axis=-1, keepdims=True)
    e = jnp.exp(logits - m)                       # exactly 0 on padded lanes
    denom = jnp.sum(e, axis=-1, keepdims=True)
    probs = e / denom

    # lane layout: [0, n_actions) -> action probs, lane n_actions -> critic value,
    # remaining lanes -> 0 (probs is already 0 there).
    out_ref[...] = jnp.where(col == n_actions, head, probs)


def prepare_params(params):
    """One-time (off the hot path) construction of kernel-ready parameters:
    bf16 weights, feature-padded w1, and the fused lane-padded head."""
    n_states = params["w1"].shape[0]
    n_actions = params["wa"].shape[1]
    assert n_actions >= 1, "softmax needs at least one action"
    assert n_actions + 1 <= HEAD_WIDTH, "fused head assumes n_actions + 1 <= 128"

    feat_pad = max(128, _round_up(n_states, 128))
    w1p = jnp.zeros((feat_pad, params["w1"].shape[1]), jnp.float32)
    w1p = w1p.at[:n_states, :].set(params["w1"])

    # fused head weight [128, 128] / bias [1, 128]:
    # columns [0, n_actions) = actor, column n_actions = critic, rest zero.
    wh = jnp.zeros((params["wa"].shape[0], HEAD_WIDTH), jnp.float32)
    wh = wh.at[:, :n_actions].set(params["wa"])
    wh = wh.at[:, n_actions:n_actions + 1].set(params["wc"])
    bh = jnp.zeros((1, HEAD_WIDTH), jnp.float32)
    bh = bh.at[:, :n_actions].set(params["ba"])
    bh = bh.at[:, n_actions:n_actions + 1].set(params["bc"])

    bf = jnp.bfloat16
    return {
        "w1": w1p.astype(bf), "b1": params["b1"],
        "w2": params["w2"].astype(bf), "b2": params["b2"],
        "w3": params["w3"].astype(bf), "b3": params["b3"],
        "wh": wh.astype(bf), "bh": bh,
    }


@functools.partial(jax.jit, static_argnames=("n_actions", "tile_b"))
def actor_critic_forward(x, kp, *, n_actions, tile_b=None):
    """Fused ActorCritic forward as a single batch-gridded Pallas call."""
    B, n_states = x.shape
    feat_pad = kp["w1"].shape[0]
    assert n_states <= feat_pad

    # Padding-aware batch tile: as few (big) tiles as possible, rounded to the
    # bf16 sublane multiple; force >=2 grid steps when B is large enough so the
    # "parallel" batch axis shards across both v7x TensorCores.
    if tile_b is None:
        n_tiles = max(1, -(-B // MAX_TILE_B))
        if n_tiles == 1 and B >= 2 * MIN_TILE_B:
            n_tiles = 2
        tile_b = _round_up(-(-B // n_tiles), MIN_TILE_B)
    b_pad = _round_up(B, tile_b)
    grid = (b_pad // tile_b,)

    # lane-dense, bf16 input slab (batch + feature padded with zeros)
    x_p = jnp.zeros((b_pad, feat_pad), jnp.bfloat16)
    x_p = x_p.at[:B, :n_states].set(x.astype(jnp.bfloat16))

    weight_args = (
        kp["w1"], kp["b1"],
        kp["w2"], kp["b2"],
        kp["w3"], kp["b3"],
        kp["wh"], kp["bh"],
    )

    def _const_spec(arr):
        # full-array block, constant index map -> weights stay VMEM-resident
        return pl.BlockSpec(arr.shape, lambda i: (0, 0))

    in_specs = [pl.BlockSpec((tile_b, feat_pad), lambda i: (i, 0))]
    in_specs += [_const_spec(a) for a in weight_args]

    flops = 2 * b_pad * (feat_pad * 256 + 256 * 256 + 256 * 128 + 128 * HEAD_WIDTH)
    bytes_accessed = (
        x_p.size * x_p.dtype.itemsize
        + b_pad * HEAD_WIDTH * 4
        + sum(int(a.size) * a.dtype.itemsize for a in weight_args)
    )
    cost = pl.CostEstimate(
        flops=int(flops),
        transcendentals=int(b_pad * HEAD_WIDTH),
        bytes_accessed=int(bytes_accessed),
    )

    out = pl.pallas_call(
        functools.partial(actor_critic_kernel, n_actions=n_actions),
        out_shape=jax.ShapeDtypeStruct((b_pad, HEAD_WIDTH), jnp.float32),
        grid=grid,
        in_specs=in_specs,
        out_specs=pl.BlockSpec((tile_b, HEAD_WIDTH), lambda i: (i, 0)),
        compiler_params=pltpu.CompilerParams(
            dimension_semantics=("parallel",)),
        cost_estimate=cost,
    )(x_p, *weight_args)

    probs = out[:B, :n_actions]
    values = out[:B, n_actions:n_actions + 1]
    return probs, values


def xavier_uniform(key, fan_in, fan_out):
    """PyTorch nn.init.xavier_uniform_ equivalent; returns [in, out] weight."""
    bound = math.sqrt(6.0 / (fan_in + fan_out))
    return jax.random.uniform(
        key, (fan_in, fan_out), dtype=jnp.float32, minval=-bound, maxval=bound
    )


def init_params(key, n_states, n_actions):
    k1, k2, k3, ka, kc = jax.random.split(key, 5)
    return {
        "w1": xavier_uniform(k1, n_states, 256),
        "b1": jnp.zeros((1, 256), jnp.float32),
        "w2": xavier_uniform(k2, 256, 256),
        "b2": jnp.zeros((1, 256), jnp.float32),
        "w3": xavier_uniform(k3, 256, 128),
        "b3": jnp.zeros((1, 128), jnp.float32),
        "wa": xavier_uniform(ka, 128, n_actions),
        "ba": jnp.zeros((1, n_actions), jnp.float32),
        "wc": xavier_uniform(kc, 128, 1),
        "bc": jnp.zeros((1, 1), jnp.float32),
    }


def reference_forward(x, p):
    """Pure-JAX f32 reference matching the PyTorch module semantics."""
    h = _leaky_relu(x @ p["w1"] + p["b1"])
    h = _leaky_relu(h @ p["w2"] + p["b2"])
    h = _leaky_relu(h @ p["w3"] + p["b3"])
    logits = h @ p["wa"] + p["ba"]
    probs = jax.nn.softmax(logits, axis=-1)
    values = h @ p["wc"] + p["bc"]
    return probs, values


def reference_forward_bf16(x, p):
    """Pure-JAX reference using the same bf16-operand / f32-accumulate scheme
    as the kernel (for a tight numerical check of the kernel itself)."""
    bf, f32 = jnp.bfloat16, jnp.float32

    def lin(h, w, b):
        return jnp.dot(h.astype(bf), w.astype(bf), preferred_element_type=f32) + b

    h = _leaky_relu(lin(x, p["w1"], p["b1"]))
    h = _leaky_relu(lin(h, p["w2"], p["b2"]))
    h = _leaky_relu(lin(h, p["w3"], p["b3"]))
    logits = lin(h, p["wa"], p["ba"])
    values = lin(h, p["wc"], p["bc"])
    probs = jax.nn.softmax(logits, axis=-1)
    return probs, values


def _check(x, params, kp, n_actions):
    probs, values = actor_critic_forward(x, kp, n_actions=n_actions)
    probs, values = jax.block_until_ready((probs, values))

    B = x.shape[0]
    assert probs.shape == (B, n_actions)
    assert values.shape == (B, 1)

    # Tight check against a bf16-matched pure-JAX reference (kernel correctness).
    mp, mv = reference_forward_bf16(x, params)
    assert jnp.allclose(probs, mp, atol=2e-3, rtol=2e-3)
    assert jnp.allclose(values, mv, atol=2e-3, rtol=2e-3)

    # Loose check against the f32 PyTorch-semantics reference (bf16 operand drift).
    rp, rv = reference_forward(x, params)
    assert jnp.allclose(probs, rp, atol=5e-2, rtol=5e-2)
    assert jnp.allclose(values, rv, atol=5e-2, rtol=5e-2)

    # Exact-divide softmax: probabilities sum to 1 to f32 precision.
    assert jnp.allclose(jnp.sum(probs, axis=-1), 1.0, atol=1e-4)


if __name__ == "__main__":
    n_states, n_actions = 32, 4

    key = jax.random.PRNGKey(0)
    k_params, k_x1, k_x2 = jax.random.split(key, 3)
    params = init_params(k_params, n_states, n_actions)
    kp = prepare_params(params)   # hoisted fused-head construction + bf16 casts

    # small batch (single 16-row tile)
    x_small = jax.random.normal(k_x1, (8, n_states), dtype=jnp.float32)
    _check(x_small, params, kp, n_actions)

    # larger, awkward batch: padding-aware tiling -> tile_b=160, grid=(2,), 320 padded rows
    x_big = jax.random.normal(k_x2, (300, n_states), dtype=jnp.float32)
    _check(x_big, params, kp, n_actions)

    print("KERNEL_OK")
</pallas_src>

<mosaic_0001>
module attributes {stable_mosaic.version = 11 : i64} {
  func.func @actor_critic_kernel(%arg0: i32, %arg1: memref<16x128xbf16, #tpu.memory_space<vmem>>, %arg2: memref<128x256xbf16, #tpu.memory_space<vmem>>, %arg3: memref<1x256xf32, #tpu.memory_space<vmem>>, %arg4: memref<256x256xbf16, #tpu.memory_space<vmem>>, %arg5: memref<1x256xf32, #tpu.memory_space<vmem>>, %arg6: memref<256x128xbf16, #tpu.memory_space<vmem>>, %arg7: memref<1x128xf32, #tpu.memory_space<vmem>>, %arg8: memref<128x128xbf16, #tpu.memory_space<vmem>>, %arg9: memref<1x128xf32, #tpu.memory_space<vmem>>, %arg10: memref<16x128xf32, #tpu.memory_space<vmem>>) attributes {dimension_semantics = [#tpu.dimension_semantics<parallel>], iteration_bounds = array<i64: 1>, scalar_prefetch = 0 : i64, scratch_operands = 0 : i64, tpu.core_type = #tpu.core_type<tc>, window_params = [{transform_indices = @transform_0, window_bounds = array<i64: 16, 128>}, {pipeline_mode = #tpu.pipeline_mode<synchronous>, transform_indices = @transform_1, window_bounds = array<i64: 128, 256>}, {pipeline_mode = #tpu.pipeline_mode<synchronous>, transform_indices = @transform_2, window_bounds = array<i64: 1, 256>}, {pipeline_mode = #tpu.pipeline_mode<synchronous>, transform_indices = @transform_3, window_bounds = array<i64: 256, 256>}, {pipeline_mode = #tpu.pipeline_mode<synchronous>, transform_indices = @transform_4, window_bounds = array<i64: 1, 256>}, {pipeline_mode = #tpu.pipeline_mode<synchronous>, transform_indices = @transform_5, window_bounds = array<i64: 256, 128>}, {pipeline_mode = #tpu.pipeline_mode<synchronous>, transform_indices = @transform_6, window_bounds = array<i64: 1, 128>}, {pipeline_mode = #tpu.pipeline_mode<synchronous>, transform_indices = @transform_7, window_bounds = array<i64: 128, 128>}, {pipeline_mode = #tpu.pipeline_mode<synchronous>, transform_indices = @transform_8, window_bounds = array<i64: 1, 128>}, {transform_indices = @transform_9, window_bounds = array<i64: 16, 128>}]} {
    %c0 = arith.constant 0 : index
    %c0_0 = arith.constant 0 : index
    %0 = vector.load %arg1[%c0, %c0_0] : memref<16x128xbf16, #tpu.memory_space<vmem>>, vector<16x128xbf16>
    %c0_1 = arith.constant 0 : index
    %c0_2 = arith.constant 0 : index
    %1 = vector.load %arg2[%c0_1, %c0_2] : memref<128x256xbf16, #tpu.memory_space<vmem>>, vector<128x256xbf16>
    %cst = arith.constant dense<0.000000e+00> : vector<16x256xf32>
    %2 = tpu.matmul %0, %1, %cst {dimension_numbers = #tpu.dot_dimension_numbers<[1], [0], [0], [1], [0, 0, 1, 1], [], []>} : vector<16x128xbf16>, vector<128x256xbf16>, vector<16x256xf32> -> vector<16x256xf32>
    %c0_3 = arith.constant 0 : index
    %c0_4 = arith.constant 0 : index
    %3 = vector.load %arg3[%c0_3, %c0_4] : memref<1x256xf32, #tpu.memory_space<vmem>>, vector<1x256xf32>
    %4 = vector.broadcast %3 : vector<1x256xf32> to vector<16x256xf32>
    %5 = arith.addf %2, %4 : vector<16x256xf32>
    %cst_5 = arith.constant 0.000000e+00 : f32
    %6 = vector.broadcast %cst_5 : f32 to vector<16x256xf32>
    %7 = arith.cmpf ogt, %5, %6 : vector<16x256xf32>
    %cst_6 = arith.constant 0.00999999977 : f32
    %8 = vector.broadcast %cst_6 : f32 to vector<16x256xf32>
    %9 = arith.mulf %8, %5 : vector<16x256xf32>
    %10 = arith.select %7, %5, %9 : vector<16x256xi1>, vector<16x256xf32>
    %11 = arith.truncf %10 : vector<16x256xf32> to vector<16x256xbf16>
    %c0_7 = arith.constant 0 : index
    %c0_8 = arith.constant 0 : index
    %12 = vector.load %arg4[%c0_7, %c0_8] : memref<256x256xbf16, #tpu.memory_space<vmem>>, vector<256x256xbf16>
    %cst_9 = arith.constant dense<0.000000e+00> : vector<16x256xf32>
    %13 = tpu.matmul %11, %12, %cst_9 {dimension_numbers = #tpu.dot_dimension_numbers<[1], [0], [0], [1], [0, 0, 1, 1], [], []>} : vector<16x256xbf16>, vector<256x256xbf16>, vector<16x256xf32> -> vector<16x256xf32>
    %c0_10 = arith.constant 0 : index
    %c0_11 = arith.constant 0 : index
    %14 = vector.load %arg5[%c0_10, %c0_11] : memref<1x256xf32, #tpu.memory_space<vmem>>, vector<1x256xf32>
    %15 = vector.broadcast %14 : vector<1x256xf32> to vector<16x256xf32>
    %16 = arith.addf %13, %15 : vector<16x256xf32>
    %cst_12 = arith.constant 0.000000e+00 : f32
    %17 = vector.broadcast %cst_12 : f32 to vector<16x256xf32>
    %18 = arith.cmpf ogt, %16, %17 : vector<16x256xf32>
    %cst_13 = arith.constant 0.00999999977 : f32
    %19 = vector.broadcast %cst_13 : f32 to vector<16x256xf32>
    %20 = arith.mulf %19, %16 : vector<16x256xf32>
    %21 = arith.select %18, %16, %20 : vector<16x256xi1>, vector<16x256xf32>
    %22 = arith.truncf %21 : vector<16x256xf32> to vector<16x256xbf16>
    %c0_14 = arith.constant 0 : index
    %c0_15 = arith.constant 0 : index
    %23 = vector.load %arg6[%c0_14, %c0_15] : memref<256x128xbf16, #tpu.memory_space<vmem>>, vector<256x128xbf16>
    %cst_16 = arith.constant dense<0.000000e+00> : vector<16x128xf32>
    %24 = tpu.matmul %22, %23, %cst_16 {dimension_numbers = #tpu.dot_dimension_numbers<[1], [0], [0], [1], [0, 0, 1, 1], [], []>} : vector<16x256xbf16>, vector<256x128xbf16>, vector<16x128xf32> -> vector<16x128xf32>
    %c0_17 = arith.constant 0 : index
    %c0_18 = arith.constant 0 : index
    %25 = vector.load %arg7[%c0_17, %c0_18] : memref<1x128xf32, #tpu.memory_space<vmem>>, vector<1x128xf32>
    %26 = vector.broadcast %25 : vector<1x128xf32> to vector<16x128xf32>
    %27 = arith.addf %24, %26 : vector<16x128xf32>
    %cst_19 = arith.constant 0.000000e+00 : f32
    %28 = vector.broadcast %cst_19 : f32 to vector<16x128xf32>
    %29 = arith.cmpf ogt, %27, %28 : vector<16x128xf32>
    %cst_20 = arith.constant 0.00999999977 : f32
    %30 = vector.broadcast %cst_20 : f32 to vector<16x128xf32>
    %31 = arith.mulf %30, %27 : vector<16x128xf32>
    %32 = arith.select %29, %27, %31 : vector<16x128xi1>, vector<16x128xf32>
    %33 = arith.truncf %32 : vector<16x128xf32> to vector<16x128xbf16>
    %c0_21 = arith.constant 0 : index
    %c0_22 = arith.constant 0 : index
    %34 = vector.load %arg8[%c0_21, %c0_22] : memref<128x128xbf16, #tpu.memory_space<vmem>>, vector<128x128xbf16>
    %cst_23 = arith.constant dense<0.000000e+00> : vector<16x128xf32>
    %35 = tpu.matmul %33, %34, %cst_23 {dimension_numbers = #tpu.dot_dimension_numbers<[1], [0], [0], [1], [0, 0, 1, 1], [], []>} : vector<16x128xbf16>, vector<128x128xbf16>, vector<16x128xf32> -> vector<16x128xf32>
    %c0_24 = arith.constant 0 : index
    %c0_25 = arith.constant 0 : index
    %36 = vector.load %arg9[%c0_24, %c0_25] : memref<1x128xf32, #tpu.memory_space<vmem>>, vector<1x128xf32>
    %37 = vector.broadcast %36 : vector<1x128xf32> to vector<16x128xf32>
    %38 = arith.addf %35, %37 : vector<16x128xf32>
    %39 = tpu.iota {dimensions = array<i32: 1>} : vector<16x128xi32>
    %c4_i32 = arith.constant 4 : i32
    %40 = vector.broadcast %c4_i32 : i32 to vector<16x128xi32>
    %41 = arith.cmpi slt, %39, %40 : vector<16x128xi32>
    %cst_26 = arith.constant 0xFF800000 : f32
    %42 = vector.broadcast %cst_26 : f32 to vector<16x128xf32>
    %43 = arith.select %41, %38, %42 : vector<16x128xi1>, vector<16x128xf32>
    %cst_27 = arith.constant dense<0xFF800000> : vector<16xf32>
    %44 = vector.multi_reduction <maximumf>, %43, %cst_27 [1] : vector<16x128xf32> to vector<16xf32>
    %45 = vector.shape_cast %44 : vector<16xf32> to vector<16x1xf32>
    %46 = vector.broadcast %45 : vector<16x1xf32> to vector<16x128xf32>
    %47 = arith.subf %43, %46 : vector<16x128xf32>
    %48 = math.exp %47 : vector<16x128xf32>
    %cst_28 = arith.constant dense<0.000000e+00> : vector<16xf32>
    %49 = vector.multi_reduction <add>, %48, %cst_28 [1] : vector<16x128xf32> to vector<16xf32>
    %50 = vector.shape_cast %49 : vector<16xf32> to vector<16x1xf32>
    %51 = vector.broadcast %50 : vector<16x1xf32> to vector<16x128xf32>
    %52 = arith.divf %48, %51 : vector<16x128xf32>
    %c4_i32_29 = arith.constant 4 : i32
    %53 = vector.broadcast %c4_i32_29 : i32 to vector<16x128xi32>
    %54 = arith.cmpi eq, %39, %53 : vector<16x128xi32>
    %55 = arith.select %54, %38, %52 : vector<16x128xi1>, vector<16x128xf32>
    %c0_30 = arith.constant 0 : index
    %c0_31 = arith.constant 0 : index
    %56 = vector.load %arg10[%c0_30, %c0_31] : memref<16x128xf32, #tpu.memory_space<vmem>>, vector<16x128xf32>
    tpu.vector_store %arg10[%c0_30, %c0_31], %55 {strides = array<i32>} : memref<16x128xf32, #tpu.memory_space<vmem>>, vector<16x128xf32>,
    return
  }
  func.func @transform_0(%arg0: i32) -> (i32, i32) {
    %c0_i32 = arith.constant 0 : i32
    %c0_i32_0 = arith.constant 0 : i32
    return %arg0, %c0_i32 : i32, i32
  }
  func.func @transform_1(%arg0: i32) -> (i32, i32) {
    %c0_i32 = arith.constant 0 : i32
    %c0_i32_0 = arith.constant 0 : i32
    %c0_i32_1 = arith.constant 0 : i32
    return %c0_i32, %c0_i32_0 : i32, i32
  }
  func.func @transform_2(%arg0: i32) -> (i32, i32) {
    %c0_i32 = arith.constant 0 : i32
    %c0_i32_0 = arith.constant 0 : i32
    %c0_i32_1 = arith.constant 0 : i32
    return %c0_i32, %c0_i32_0 : i32, i32
  }
  func.func @transform_3(%arg0: i32) -> (i32, i32) {
    %c0_i32 = arith.constant 0 : i32
    %c0_i32_0 = arith.constant 0 : i32
    %c0_i32_1 = arith.constant 0 : i32
    return %c0_i32, %c0_i32_0 : i32, i32
  }
  func.func @transform_4(%arg0: i32) -> (i32, i32) {
    %c0_i32 = arith.constant 0 : i32
    %c0_i32_0 = arith.constant 0 : i32
    %c0_i32_1 = arith.constant 0 : i32
    return %c0_i32, %c0_i32_0 : i32, i32
  }
  func.func @transform_5(%arg0: i32) -> (i32, i32) {
    %c0_i32 = arith.constant 0 : i32
    %c0_i32_0 = arith.constant 0 : i32
    %c0_i32_1 = arith.constant 0 : i32
    return %c0_i32, %c0_i32_0 : i32, i32
  }
  func.func @transform_6(%arg0: i32) -> (i32, i32) {
    %c0_i32 = arith.constant 0 : i32
    %c0_i32_0 = arith.constant 0 : i32
    %c0_i32_1 = arith.constant 0 : i32
    return %c0_i32, %c0_i32_0 : i32, i32
  }
  func.func @transform_7(%arg0: i32) -> (i32, i32) {
    %c0_i32 = arith.constant 0 : i32
    %c0_i32_0 = arith.constant 0 : i32
    %c0_i32_1 = arith.constant 0 : i32
    return %c0_i32, %c0_i32_0 : i32, i32
  }
  func.func @transform_8(%arg0: i32) -> (i32, i32) {
    %c0_i32 = arith.constant 0 : i32
    %c0_i32_0 = arith.constant 0 : i32
    %c0_i32_1 = arith.constant 0 : i32
    return %c0_i32, %c0_i32_0 : i32, i32
  }
  func.func @transform_9(%arg0: i32) -> (i32, i32) {
    %c0_i32 = arith.constant 0 : i32
    %c0_i32_0 = arith.constant 0 : i32
    return %arg0, %c0_i32 : i32, i32
  }
}

</mosaic_0001>

<bundles_post_ra>
// kernel: actor_critic_forward.1
= control target key start
LH: loop header
LB: loop body
LE: loop exit
PB: predicated region body
PF: predicated region fallthrough
CT: control target
= control target key end

     0   :  { %14 = vsyncpa [#allocation3], 0  ;;  %s1276_s0 = inlined_call_operand.vmem [shape: bf16[16,128], index: 0, kind: input, shape index: {}]   ;;  %s1277_s1 = inlined_call_operand.hbm [shape: bf16[128,256], index: 1, kind: input, shape index: {}]   ;;  %s1278_s2 = inlined_call_operand.vmem [shape: f32[1,256], index: 2, kind: input, shape index: {}]   ;;  %s1279_s3 = inlined_call_operand.hbm [shape: bf16[256,256], index: 3, kind: input, shape index: {}]   ;;  %s1280_s4 = inlined_call_operand.vmem [shape: f32[1,256], index: 4, kind: input, shape index: {}]   ;;  %s1281_s5 = inlined_call_operand.hbm [shape: bf16[256,128], index: 5, kind: input, shape index: {}]   ;;  %s1282_s6 = inlined_call_operand.vmem [shape: f32[1,128], index: 6, kind: input, shape index: {}]   ;;  %s1283_s7 = inlined_call_operand.hbm [shape: bf16[128,128], index: 7, kind: input, shape index: {}]   ;;  %s1284_s8 = inlined_call_operand.vmem [shape: f32[1,128], index: 8, kind: input, shape index: {}]   ;;  %s1285_s9 = inlined_call_operand.vmem [shape: f32[16,128], index: 9, kind: output, shape index: {}]  }
   0x1   :  { %15 = vsyncpa [#allocation5], 0 }
   0x2   :  { %16 = vsyncpa [#allocation8], 0  ;;  %s1180_s30 = smov [#allocation4]   ;;  %s1181_s11 = smov [#allocation2]  }
   0x3   :  { %s38_s10 = sshll.u32 %s1180_s30, 4  ;;  %s24_s12 = sshll.u32 %s1181_s11, 4  ;;  %s39_s10 = int_to_ptr.vmem [resolvable:$true] %s38_s10  ;;  %s25_s12 = int_to_ptr.vmem [resolvable:$true] %s24_s12 }
   0x4   :  { %s1102_s13 = scalar_lea.vmem %s39_s10, 4096  ;;  %p1107_p1 = scmp.lt.s32.totalorder %s39_s10, %s39_s10 }
   0x5   :  { %p1103_p0 = scmp.ne.s32.totalorder %s39_s10, %s1102_s13  ;;  %p1108_p2 = scmp.lt.s32.totalorder %s1102_s13, %s1102_s13 }
   0x7   :  { %p1109_p3 = por %p1108_p2, %p1107_p1 }
   0x9   :  { %p1110_p4 = pnand %p1109_p3, %p1103_p0 }
   0xb   :  { %1113 = shalt.err (!%p1110_p4)
}
   0xc   :  { %s1182_s14 = smov 128   ;;  %s1183_s15 = smov 8  }
   0xd   :  { %44 = dma.hbm_to_vmem [thread:$0]  %s1279_s3, 4096, %s39_s10, [#allocation5], %s1182_s14, %s1182_s14, %s1183_s15  }
   0xe   :  { %s1122_s18 = scalar_lea.vmem %s25_s12, 2048  ;;  %p1127_p6 = scmp.lt.s32.totalorder %s25_s12, %s25_s12 }
   0xf   :  { %p1123_p5 = scmp.ne.s32.totalorder %s25_s12, %s1122_s18  ;;  %p1128_p7 = scmp.lt.s32.totalorder %s1122_s18, %s1122_s18 }
  0x11   :  { %p1129_p8 = por %p1128_p7, %p1127_p6 }
  0x13   :  { %p1130_p9 = pnand %p1129_p8, %p1123_p5 }
  0x15   :  { %1133 = shalt.err (!%p1130_p9)
}
  0x16   :  { %30 = dma.hbm_to_vmem [thread:$0]  %s1277_s1, 2048, %s25_s12, [#allocation3], %s1182_s14, %s1182_s14, %s1183_s15  }
  0x17   :  { %s1184_s21 = smov [#allocation6]  }
  0x18   :  { %s52_s22 = sshll.u32 %s1184_s21, 4  ;;  %s53_s22 = int_to_ptr.vmem [resolvable:$true] %s52_s22 }
  0x19   :  { %s1142_s23 = scalar_lea.vmem %s53_s22, 2048  ;;  %p1147_p11 = scmp.lt.s32.totalorder %s53_s22, %s53_s22 }
  0x1a   :  { %p1143_p10 = scmp.ne.s32.totalorder %s53_s22, %s1142_s23  ;;  %p1148_p12 = scmp.lt.s32.totalorder %s1142_s23, %s1142_s23 }
  0x1c   :  { %p1149_p13 = por %p1148_p12, %p1147_p11 }
  0x1e   :  { %p1150_p0 = pnand %p1149_p13, %p1143_p10 }
  0x20   :  { %1153 = shalt.err (!%p1150_p0)
}
  0x21   :  { %s1185_s3 = smov 64   ;;  %s1186_s24 = smov 4  }
  0x22   :  { %58 = dma.hbm_to_vmem [thread:$0]  %s1281_s5, 2048, %s53_s22, [#allocation5], %s1185_s3, %s1185_s3, %s1186_s24  }
  0x23   :  { %s1187_s27 = smov [#allocation7]  }
  0x24   :  { %s66_s28 = sshll.u32 %s1187_s27, 4  ;;  %s67_s28 = int_to_ptr.vmem [resolvable:$true] %s66_s28 }
  0x25   :  { %s1162_s1 = scalar_lea.vmem %s67_s28, 1024  ;;  %p1167_p2 = scmp.lt.s32.totalorder %s67_s28, %s67_s28 }
  0x26   :  { %p1163_p1 = scmp.ne.s32.totalorder %s67_s28, %s1162_s1  ;;  %p1168_p3 = scmp.lt.s32.totalorder %s1162_s1, %s1162_s1 }
  0x28   :  { %p1169_p4 = por %p1168_p3, %p1167_p2 }
  0x2a   :  { %p1170_p5 = pnand %p1169_p4, %p1163_p1 }
  0x2c   :  { %1173 = shalt.err (!%p1170_p5)
}
  0x2d   :  { %72 = dma.hbm_to_vmem [thread:$0]  %s1283_s7, 1024, %s67_s28, [#allocation8], %s1185_s3, %s1185_s3, %s1186_s24  }
  0x2e   :  { %1174 = dma.done.wait [#allocation3], 2048  }
  0x2f   :  { %1175 = vsyncadd [#allocation3], 4294965248 }
  0x30   :  { %1176 = dma.done.wait [#allocation5], 6144  }
  0x31   :  { %1177 = vsyncadd [#allocation5], 4294961152 }
  0x32   :  { %1178 = dma.done.wait [#allocation8], 1024  }
  0x33   :  { %1179 = vsyncadd [#allocation8], 4294966272  ;;  %v1188_v0 = vmov 0   ;;  %v989_v1 = vld [vmem:[#allocation2 + $0x74] ss:$8 sps:$4 sm:$0xff]   ;;  %v1013_v27 = vld [vmem:[%s1276_s0] sm:$0xff]   ;;  %v108_v59 = vlaneseq }
  0x34   :  { %236 = vmatprep.mubr.bf16.mxu0 %v1188_v0  ;;  %v991_v2 = vld [vmem:[#allocation2 + $0x70] ss:$8 sps:$4 sm:$0xff]   ;;  %204 = vmatprep.subr.bf16.mxu0 %v989_v1  ;;  %v992_v3 = vld [vmem:[#allocation2 + $0x64] ss:$8 sps:$4 sm:$0xff]   ;;  %v994_v4 = vld [vmem:[#allocation2 + $0x60] ss:$8 sps:$4 sm:$0xff]  }
  0x35   :  { %205 = vmatpush1.bf16.msra.mxu0 %v991_v2  ;;  %v995_v5 = vld [vmem:[#allocation2 + $0x54] ss:$8 sps:$4 sm:$0xff]   ;;  %v997_v6 = vld [vmem:[#allocation2 + $0x50] ss:$8 sps:$4 sm:$0xff]   ;;  %v998_v7 = vld [vmem:[#allocation2 + $0x44] ss:$8 sps:$4 sm:$0xff]  }
  0x36   :  { %206 = vmatprep.subr.bf16.mxu0 %v992_v3  ;;  %v1000_v8 = vld [vmem:[#allocation2 + $0x40] ss:$8 sps:$4 sm:$0xff]   ;;  %v1001_v9 = vld [vmem:[#allocation2 + $0x34] ss:$8 sps:$4 sm:$0xff]   ;;  %v1016_v11 = vld [vmem:[#allocation4 + $0x70] ss:$8 sps:$4 sm:$0xff]  }
  0x37   :  { %v1014_v10 = vld [vmem:[#allocation4 + $0x74] ss:$8 sps:$4 sm:$0xff]   ;;  %v1017_v12 = vld [vmem:[#allocation4 + $0x64] ss:$8 sps:$4 sm:$0xff]   ;;  %v1003_v13 = vld [vmem:[#allocation2 + $0x30] ss:$8 sps:$4 sm:$0xff]  }
  0x38   :  { %465 = vmatprep.subr.bf16.mxu1 %v1014_v10  ;;  %v1019_v14 = vld [vmem:[#allocation4 + $0x60] ss:$8 sps:$4 sm:$0xff]   ;;  %v1004_v15 = vld [vmem:[#allocation2 + $0x24] ss:$8 sps:$4 sm:$0xff]   ;;  %v1020_v16 = vld [vmem:[#allocation4 + $0x54] ss:$8 sps:$4 sm:$0xff]  }
  0x39   :  { %207 = vmatpush1.bf16.msra.mxu0 %v994_v4  ;;  %466 = vmatpush1.bf16.msra.mxu1 %v1016_v11  ;;  %v1006_v17 = vld [vmem:[#allocation2 + $0x20] ss:$8 sps:$4 sm:$0xff]   ;;  %v1022_v18 = vld [vmem:[#allocation4 + $0x50] ss:$8 sps:$4 sm:$0xff]   ;;  %v1007_v19 = vld [vmem:[#allocation2 + $0x14] ss:$8 sps:$4 sm:$0xff]  }
  0x3a   :  { %208 = vmatprep.subr.bf16.mxu0 %v995_v5  ;;  %467 = vmatprep.subr.bf16.mxu1 %v1017_v12  ;;  %v1023_v20 = vld [vmem:[#allocation4 + $0x44] ss:$8 sps:$4 sm:$0xff]   ;;  %v1009_v21 = vld [vmem:[#allocation2 + $0x10] ss:$8 sps:$4 sm:$0xff]   ;;  %v1025_v22 = vld [vmem:[#allocation4 + $0x40] ss:$8 sps:$4 sm:$0xff]  }
  0x3b   :  { %v1010_v23 = vld [vmem:[#allocation2 + $0x4] ss:$8 sps:$4 sm:$0xff]   ;;  %v1026_v24 = vld [vmem:[#allocation4 + $0x34] ss:$8 sps:$4 sm:$0xff]   ;;  %v1012_v25 = vld [vmem:[#allocation2] ss:$8 sps:$4 sm:$0xff]  }
  0x3c   :  { %v1028_v26 = vld [vmem:[#allocation4 + $0x30] ss:$8 sps:$4 sm:$0xff]   ;;  %v1029_v28 = vld [vmem:[#allocation4 + $0x24] ss:$8 sps:$4 sm:$0xff]   ;;  %v1031_v29 = vld [vmem:[#allocation4 + $0x20] ss:$8 sps:$4 sm:$0xff]  }
  0x3d   :  { %209 = vmatpush1.bf16.msra.mxu0 %v997_v6  ;;  %468 = vmatpush1.bf16.msra.mxu1 %v1019_v14  ;;  %v1032_v30 = vld [vmem:[#allocation4 + $0x14] ss:$8 sps:$4 sm:$0xff]   ;;  %v1034_v31 = vld [vmem:[#allocation4 + $0x10] ss:$8 sps:$4 sm:$0xff]   ;;  %v1035_v32 = vld [vmem:[#allocation4 + $0x4] ss:$8 sps:$4 sm:$0xff]  }
  0x3e   :  { %210 = vmatprep.subr.bf16.mxu0 %v998_v7  ;;  %469 = vmatprep.subr.bf16.mxu1 %v1020_v16  ;;  %v1037_v33 = vld [vmem:[#allocation4] ss:$8 sps:$4 sm:$0xff]   ;;  %v1038_v34 = vld [vmem:[#allocation4 + $0xf4] ss:$8 sps:$4 sm:$0xff]   ;;  %v1040_v35 = vld [vmem:[#allocation4 + $0xf0] ss:$8 sps:$4 sm:$0xff]  }
  0x3f   :  { %v1041_v36 = vld [vmem:[#allocation4 + $0xe4] ss:$8 sps:$4 sm:$0xff]   ;;  %v1043_v37 = vld [vmem:[#allocation4 + $0xe0] ss:$8 sps:$4 sm:$0xff]   ;;  %v1044_v38 = vld [vmem:[#allocation4 + $0xd4] ss:$8 sps:$4 sm:$0xff]  }
  0x40   :  { %v1046_v39 = vld [vmem:[#allocation4 + $0xd0] ss:$8 sps:$4 sm:$0xff]   ;;  %v1047_v40 = vld [vmem:[#allocation4 + $0xc4] ss:$8 sps:$4 sm:$0xff]   ;;  %v1049_v41 = vld [vmem:[#allocation4 + $0xc0] ss:$8 sps:$4 sm:$0xff]  }
  0x41   :  { %211 = vmatpush1.bf16.msra.mxu0 %v1000_v8  ;;  %470 = vmatpush1.bf16.msra.mxu1 %v1022_v18  ;;  %v1050_v42 = vld [vmem:[#allocation4 + $0xb4] ss:$8 sps:$4 sm:$0xff]   ;;  %v1052_v43 = vld [vmem:[#allocation4 + $0xb0] ss:$8 sps:$4 sm:$0xff]   ;;  %v1053_v44 = vld [vmem:[#allocation4 + $0xa4] ss:$8 sps:$4 sm:$0xff]  }
  0x42   :  { %212 = vmatprep.subr.bf16.mxu0 %v1001_v9  ;;  %471 = vmatprep.subr.bf16.mxu1 %v1023_v20  ;;  %v1055_v45 = vld [vmem:[#allocation4 + $0xa0] ss:$8 sps:$4 sm:$0xff]   ;;  %v1056_v46 = vld [vmem:[#allocation4 + $0x94] ss:$8 sps:$4 sm:$0xff]   ;;  %v1058_v47 = vld [vmem:[#allocation4 + $0x90] ss:$8 sps:$4 sm:$0xff]  }
  0x43   :  { %v1059_v48 = vld [vmem:[#allocation4 + $0x84] ss:$8 sps:$4 sm:$0xff]   ;;  %v1061_v49 = vld [vmem:[#allocation4 + $0x80] ss:$8 sps:$4 sm:$0xff]   ;;  %v1062_v50 = vld [vmem:[#allocation6 + $0x78] sm:$0xff]   ;;  %v109_v60 = vshrl.u32 %v108_v59, 7 }
  0x44   :  { %v1063_v51 = vld [vmem:[#allocation6 + $0x38] sm:$0xff]   ;;  %v1064_v52 = vld [vmem:[#allocation6 + $0x70] sm:$0xff]   ;;  %v1066_v54 = vld [vmem:[#allocation6 + $0x68] sm:$0xff]   ;;  %vm1190_vm8 = vmmov 0  }
  0x45   :  { %213 = vmatpush1.bf16.msra.mxu0 %v1003_v13  ;;  %472 = vmatpush1.bf16.msra.mxu1 %v1025_v22  ;;  %v1065_v53 = vld [vmem:[#allocation6 + $0x30] sm:$0xff]   ;;  %v1067_v55 = vld [vmem:[#allocation6 + $0x28] sm:$0xff]   ;;  %v1068_v56 = vld [vmem:[#allocation6 + $0x60] sm:$0xff]   ;;  %v114_v61 = vsub.s32 1, %v109_v60  ;;  %v110_v62 = vsub.s32 0, %v109_v60 }
  0x46   :  { %214 = vmatprep.subr.bf16.mxu0 %v1004_v15  ;;  %473 = vmatprep.subr.bf16.mxu1 %v1026_v24  ;;  %v1069_v57 = vld [vmem:[#allocation6 + $0x20] sm:$0xff]   ;;  %v1070_v58 = vld [vmem:[#allocation6 + $0x58] sm:$0xff]   ;;  %v1073_v22 = vld [vmem:[#allocation6 + $0x10] sm:$0xff]  }
  0x47   :  { %v106_v63 = vld [vmem:[%s1278_s2] sm:$0x3]  ;;  %v1071_v20 = vld [vmem:[#allocation6 + $0x18] sm:$0xff]   ;;  %v1075_v24 = vld [vmem:[#allocation6 + $0x8] sm:$0xff]  }
  0x48   :  { %v115_v0 = vrot.slane %v106_v63, %v114_v61  ;;  %v111_v1 = vrot.slane %v106_v63, %v110_v62 }
  0x49   :  { %215 = vmatpush1.bf16.msra.mxu0 %v1006_v17  ;;  %474 = vmatpush1.bf16.msra.mxu1 %v1028_v26  ;;  %v1077_v26 = vld [vmem:[#allocation6] sm:$0xff]  }
  0x4a   :  { %216 = vmatprep.subr.bf16.mxu0 %v1007_v19  ;;  %475 = vmatprep.subr.bf16.mxu1 %v1029_v28  ;;  %v293_v28 = vld [vmem:[%s1280_s4] sm:$0x3] }
  0x4d   :  { %217 = vmatpush1.bf16.msra.mxu0 %v1009_v21  ;;  %476 = vmatpush1.bf16.msra.mxu1 %v1031_v29  ;;  %v1072_v21 = vld [vmem:[#allocation6 + $0x50] sm:$0xff]   ;;  %v302_v29 = vrot.slane %v293_v28, %v114_v61 }
  0x4e   :  { %218 = vmatprep.subr.bf16.mxu0 %v1010_v23  ;;  %477 = vmatprep.subr.bf16.mxu1 %v1032_v30  ;;  %v1074_v23 = vld [vmem:[#allocation6 + $0x48] sm:$0xff]   ;;  %v298_v30 = vrot.slane %v293_v28, %v110_v62 }
  0x51   :  { %219 = vmatpush1.bf16.msra.mxu0 %v1012_v25  ;;  %478 = vmatpush1.bf16.msra.mxu1 %v1034_v31  ;;  %v1076_v25 = vld [vmem:[#allocation6 + $0x40] sm:$0xff]  }
  0x52   :  { %479 = vmatprep.subr.bf16.mxu1 %v1035_v32  ;;  %927 = vmatprep.subr.bf16.mxu0 %v1062_v50  ;;  %v1079_v50 = vld [vmem:[#allocation7 + $0x30] sm:$0xff]  }
  0x54   :  { %237 = vmatmul.mubr.bf16.vlgmr.msra.gmra.mxu0 %v1013_v27  ;;  %v1189_v27 = vmov 0.0  }
  0x55   :  { %480 = vmatpush1.bf16.msra.mxu1 %v1037_v33  ;;  %928 = vmatpush3.bf16.msra.mxu0 %v1063_v51  ;;  %v1080_v51 = vld [vmem:[#allocation7 + $0x28] sm:$0xff]  }
  0x56   :  { %481 = vmatprep.subr.bf16.mxu1 %v1038_v34  ;;  %929 = vmatprep.subr.bf16.mxu0 %v1064_v52  ;;  %v1081_v52 = vld [vmem:[#allocation7 + $0x20] sm:$0xff]  }
  0x59   :  { %482 = vmatpush2.bf16.msra.mxu1 %v1040_v35  ;;  %930 = vmatpush3.bf16.msra.mxu0 %v1065_v53  ;;  %v1082_v53 = vld [vmem:[#allocation7 + $0x18] sm:$0xff]  }
  0x5a   :  { %483 = vmatprep.subr.bf16.mxu1 %v1041_v36  ;;  %931 = vmatprep.subr.bf16.mxu0 %v1066_v54  ;;  %v1083_v54 = vld [vmem:[#allocation7 + $0x10] sm:$0xff]  }
  0x5d   :  { %484 = vmatpush2.bf16.msra.mxu1 %v1043_v37  ;;  %932 = vmatpush3.bf16.msra.mxu0 %v1067_v55  ;;  %v1084_v55 = vld [vmem:[#allocation7 + $0x8] sm:$0xff]  }
  0x5e   :  { %485 = vmatprep.subr.bf16.mxu1 %v1044_v38  ;;  %933 = vmatprep.subr.bf16.mxu0 %v1068_v56  ;;  %v1085_v56 = vld [vmem:[#allocation7] sm:$0xff]  }
  0x61   :  { %486 = vmatpush2.bf16.msra.mxu1 %v1046_v39  ;;  %934 = vmatpush3.bf16.msra.mxu0 %v1069_v57 }
  0x62   :  { %487 = vmatprep.subr.bf16.mxu1 %v1047_v40  ;;  %935 = vmatprep.subr.bf16.mxu0 %v1070_v58  ;;  %v901_v58 = vld [vmem:[%s1282_s6] ss:$0 sm:$0xff] }
  0x65   :  { %488 = vmatpush2.bf16.msra.mxu1 %v1049_v41  ;;  %936 = vmatpush3.bf16.msra.mxu0 %v1071_v20 }
  0x66   :  { %489 = vmatprep.subr.bf16.mxu1 %v1050_v42  ;;  %937 = vmatprep.subr.bf16.mxu0 %v1072_v21 }
  0x69   :  { %490 = vmatpush2.bf16.msra.mxu1 %v1052_v43  ;;  %938 = vmatpush3.bf16.msra.mxu0 %v1073_v22 }
  0x6a   :  { %491 = vmatprep.subr.bf16.mxu1 %v1053_v44  ;;  %939 = vmatprep.subr.bf16.mxu0 %v1074_v23 }
  0x6d   :  { %492 = vmatpush2.bf16.msra.mxu1 %v1055_v45  ;;  %940 = vmatpush3.bf16.msra.mxu0 %v1075_v24 }
  0x6e   :  { %493 = vmatprep.subr.bf16.mxu1 %v1056_v46  ;;  %941 = vmatprep.subr.bf16.mxu0 %v1076_v25 }
  0x71   :  { %494 = vmatpush2.bf16.msra.mxu1 %v1058_v47  ;;  %942 = vmatpush3.bf16.msra.mxu0 %v1077_v26 }
  0x72   :  { %495 = vmatprep.subr.bf16.mxu1 %v1059_v48  ;;  %958 = vmatprep.subr.bf16.mxu0 %v1189_v27  ;;  %v1078_v48 = vld [vmem:[#allocation7 + $0x38] sm:$0xff]  }
  0x75   :  { %496 = vmatpush2.bf16.msra.mxu1 %v1061_v49 }
 0x114   :  { %v238_v2 = vpop.f32.mrf.mxu0 }
 0x115   :  { %v239_v5 = vadd.f32 %v238_v2, %v111_v1 }
 0x116   :  { %v240_v3 = vpop.f32.mrf.mxu0 }
 0x117   :  { %v241_v4 = vadd.f32 %v240_v3, %v115_v0  ;;  %v251_v12 = vmul.f32 0.01, %v239_v5  ;;  %vm247_vm2 = vcmp.gt.f32.partialorder %v239_v5, 0.0 }
 0x118   :  { %v242_v6 = vpop.f32.mrf.mxu0 }
 0x119   :  { %v243_v7 = vadd.f32 %v242_v6, %v111_v1  ;;  %v252_v9 = vmul.f32 0.01, %v241_v4  ;;  %vm248_vm1 = vcmp.gt.f32.partialorder %v241_v4, 0.0  ;;  %v255_v18 = vsel %vm247_vm2, %v239_v5, %v251_v12 }
 0x11a   :  { %v244_v8 = vpop.f32.mrf.mxu0 }
 0x11b   :  { %vm249_vm0 = vcmp.gt.f32.partialorder %v243_v7, 0.0  ;;  %v253_v10 = vmul.f32 0.01, %v243_v7  ;;  %v245_v11 = vadd.f32 %v244_v8, %v115_v0  ;;  %v256_v15 = vsel %vm248_vm1, %v241_v4, %v252_v9  ;;  %v918_v9 = vld [vmem:[%s1284_s8] ss:$0 sm:$0xff] }
 0x11c   :  { %v818_v8 = vand.u32 127, %v108_v59 }
 0x11d   :  { %v254_v13 = vmul.f32 0.01, %v245_v11  ;;  %vm250_vm3 = vcmp.gt.f32.partialorder %v245_v11, 0.0  ;;  %v257_v14 = vsel %vm249_vm0, %v243_v7, %v253_v10 }
 0x11e   :  { %v259_v19 = vpack.c.bf16 %v257_v14, %v255_v18  ;;  %vm819_vm11 = vcmp.lt.s32.totalorder %v818_v8, 4  ;;  %vm840_vm12 = vcmp.eq.s32.totalorder %v818_v8, 4 }
 0x11f   :  { %v258_v16 = vsel %vm250_vm3, %v245_v11, %v254_v13 }
 0x120   :  { %v260_v17 = vpack.c.bf16 %v258_v16, %v256_v15 }
 0x122   :  { %497 = vmatprep.mubr.bf16.mxu1 %v260_v17 }
 0x123   :  { %498 = vmatmul.mubr.bf16.vlgmr.msra.gmra.mxu1 %v259_v19 }
 0x1e3   :  { %v499_v31 = vpop.f32.mrf.mxu1 }
 0x1e4   :  { %v500_v34 = vadd.f32 %v499_v31, %v298_v30 }
 0x1e5   :  { %v501_v32 = vpop.f32.mrf.mxu1 }
 0x1e6   :  { %v502_v33 = vadd.f32 %v501_v32, %v302_v29  ;;  %v512_v41 = vmul.f32 0.01, %v500_v34  ;;  %vm508_vm6 = vcmp.gt.f32.partialorder %v500_v34, 0.0 }
 0x1e7   :  { %v503_v35 = vpop.f32.mrf.mxu1 }
 0x1e8   :  { %v504_v36 = vadd.f32 %v503_v35, %v298_v30  ;;  %v513_v38 = vmul.f32 0.01, %v502_v33  ;;  %vm509_vm5 = vcmp.gt.f32.partialorder %v502_v33, 0.0  ;;  %v516_v46 = vsel %vm508_vm6, %v500_v34, %v512_v41 }
 0x1e9   :  { %v505_v37 = vpop.f32.mrf.mxu1 }
 0x1ea   :  { %vm510_vm4 = vcmp.gt.f32.partialorder %v504_v36, 0.0  ;;  %v514_v39 = vmul.f32 0.01, %v504_v36  ;;  %v506_v40 = vadd.f32 %v505_v37, %v302_v29  ;;  %v517_v44 = vsel %vm509_vm5, %v502_v33, %v513_v38 }
 0x1ec   :  { %vm511_vm7 = vcmp.gt.f32.partialorder %v506_v40, 0.0  ;;  %v515_v42 = vmul.f32 0.01, %v506_v40  ;;  %v518_v43 = vsel %vm510_vm4, %v504_v36, %v514_v39 }
 0x1ed   :  { %v520_v49 = vpack.c.bf16 %v518_v43, %v516_v46 }
 0x1ee   :  { %v519_v45 = vsel %vm511_vm7, %v506_v40, %v515_v42 }
 0x1ef   :  { %v521_v47 = vpack.c.bf16 %v519_v45, %v517_v44 }
 0x1f1   :  { %689 = vmatprep.mubr.bf16.mxu0 %v521_v47 }
 0x1f2   :  { %690 = vmatmul.mubr.bf16.vlgmr.msra.gmra.mxu0 %v520_v49 }
 0x1f3   :  { %959 = vmatpush3.bf16.msra.mxu0 %v1078_v48  ;;  %974 = vmatprep.mubr.msk.bf16.mxu0 %vm1190_vm8, %v1189_v27 }
 0x1f4   :  { %960 = vmatprep.subr.bf16.mxu0 %v1189_v27 }
 0x1f7   :  { %961 = vmatpush3.bf16.msra.mxu0 %v1079_v50 }
 0x1f8   :  { %962 = vmatprep.subr.bf16.mxu0 %v1189_v27 }
 0x1fb   :  { %963 = vmatpush3.bf16.msra.mxu0 %v1080_v51 }
 0x1fc   :  { %964 = vmatprep.subr.bf16.mxu0 %v1189_v27 }
 0x1ff   :  { %965 = vmatpush3.bf16.msra.mxu0 %v1081_v52 }
 0x200   :  { %966 = vmatprep.subr.bf16.mxu0 %v1189_v27 }
 0x203   :  { %967 = vmatpush3.bf16.msra.mxu0 %v1082_v53 }
 0x204   :  { %968 = vmatprep.subr.bf16.mxu0 %v1189_v27 }
 0x207   :  { %969 = vmatpush3.bf16.msra.mxu0 %v1083_v54 }
 0x208   :  { %970 = vmatprep.subr.bf16.mxu0 %v1189_v27 }
 0x20b   :  { %971 = vmatpush3.bf16.msra.mxu0 %v1084_v55 }
 0x20c   :  { %972 = vmatprep.subr.bf16.mxu0 %v1189_v27 }
 0x20f   :  { %973 = vmatpush3.bf16.msra.mxu0 %v1085_v56 }
 0x2b2   :  { %v943_v57 = vpop.f32.mrf.mxu0 }
 0x2b4   :  { %v944_v60 = vpop.f32.mrf.mxu0 }
 0x2b5   :  { %v945_v61 = vadd.f32 %v944_v60, %v943_v57 }
 0x2b6   :  { %v946_v62 = vpop.f32.mrf.mxu0 }
 0x2b7   :  { %v692_v63 = vadd.f32 %v945_v61, %v901_v58 }
 0x2b8   :  { %v947_v0 = vpop.f32.mrf.mxu0 }
 0x2b9   :  { %v948_v1 = vadd.f32 %v947_v0, %v946_v62  ;;  %v700_v2 = vmul.f32 0.01, %v692_v63  ;;  %vm698_vm9 = vcmp.gt.f32.partialorder %v692_v63, 0.0 }
 0x2bb   :  { %v695_v3 = vadd.f32 %v948_v1, %v901_v58  ;;  %v702_v5 = vsel %vm698_vm9, %v692_v63, %v700_v2 }
 0x2bd   :  { %vm699_vm10 = vcmp.gt.f32.partialorder %v695_v3, 0.0  ;;  %v701_v4 = vmul.f32 0.01, %v695_v3 }
 0x2bf   :  { %v703_v6 = vsel %vm699_vm10, %v695_v3, %v701_v4 }
 0x2c0   :  { %v704_v7 = vpack.c.bf16 %v703_v6, %v702_v5 }
 0x2c2   :  { %975 = vmatmul.mubr.bf16.vlgmr.msra.gmra.mxu0 %v704_v7 }
 0x382   :  { %v810_v10 = vpop.f32.mrf.mxu0 }
 0x383   :  { %v811_v11 = vadd.f32 %v918_v9, %v810_v10 }
 0x384   :  { %v976_v12 = vpop.f32.mrf.mxu0 }
 0x385   :  { %v820_v13 = vsel %vm819_vm11, %v811_v11, -inf }
 0x386   :  { %822 = vmax.xlane.f32.xlu0 %v820_v13  ;;  %v813_v14 = vpop.f32.mrf.mxu0 }
 0x387   :  { %v814_v15 = vadd.f32 %v918_v9, %v813_v14 }
 0x388   :  { %v977_v16 = vpop.f32.mrf.mxu0 }
 0x389   :  { %v821_v17 = vsel %vm819_vm11, %v814_v15, -inf }
 0x38a   :  { %824 = vmax.xlane.f32.xlu0 %v821_v17 }
 0x40f   :  { %v823_v18 = vpop.xlane.xlu0 %822 }
 0x410   :  { %v826_v19 = vsub.f32 %v820_v13, %v823_v18 }
 0x412   :  { %v828_v20 = vmul.f32 1.442695, %v826_v19 }
 0x413   :  { %v825_v21 = vpop.xlane.xlu0 %824 }
 0x414   :  { %1086 = vpow2.f32 %v828_v20  ;;  %v827_v59 = vsub.f32 %v821_v17, %v825_v21 }
 0x416   :  { %v830_v22 = vmul.f32 1.442695, %v827_v59 }
 0x418   :  { %1088 = vpow2.f32 %v830_v22 }
 0x421   :  { %v1087_v23 = vpop.eup %1086 }
 0x422   :  { %832 = vadd.xlane.f32.xlu1 %v1087_v23 }
 0x425   :  { %v1089_v24 = vpop.eup %1088 }
 0x426   :  { %834 = vadd.xlane.f32.xlu1 %v1089_v24 }
 0x4ab   :  { %v833_v25 = vpop.xlane.xlu1 %832 }
 0x4ac   :  { %1090 = vrcp.f32 %v833_v25 }
 0x4af   :  { %v835_v26 = vpop.xlane.xlu1 %834 }
 0x4b0   :  { %1092 = vrcp.f32 %v835_v26 }
 0x4b9   :  { %v1091_v27 = vpop.eup %1090 }
 0x4ba   :  { %v837_v28 = vmul.f32 %v1091_v27, %v1087_v23 }
 0x4bc   :  { %v841_v29 = vsel %vm840_vm12, %v811_v11, %v837_v28 }
 0x4bd   :  { %v1093_v30 = vpop.eup %1092  ;;  %843 = vst [vmem:[%s1285_s9] sm:$0xff] %v841_v29 }
 0x4be   :  { %v839_v31 = vmul.f32 %v1093_v30, %v1089_v24 }
 0x4c0   :  { %v842_v32 = vsel %vm840_vm12, %v814_v15, %v839_v31 }
 0x4c1   :  { %844 = vst [vmem:[%s1285_s9 + $0x8] sm:$0xff] %v842_v32 }
 0x4c2   :  { %849 = vsyncpa [#allocation3], 1 }
 0x4c3   :  { %850 = vsyncpa [#allocation5], 1 }
 0x4c4   :  { %851 = vsyncpa [#allocation8], 1 }

</bundles_post_ra>
